<compile_context>
chip_gen: v7x
topology: tpu7x:2x2x1
jax: 0.10.0
libtpu: 0.0.40
codegen_flags: <defaults>
</compile_context>

<pallas_src>
import functools

import jax
import jax.numpy as jnp
from jax import lax
from jax.experimental import pallas as pl
from jax.experimental.pallas import tpu as pltpu

LANES = 128
SUBLANES = 8
NUM_CORES = 2  # v7x has 2 TensorCores; harmless (same total work) on v5e/v6e.


def _rmsle_kernel(scale_ref, x_ref, y_ref, acc_ref, *, valid_rows):
    j = pl.program_id(1)

    @pl.when(j == 0)
    def _():
        acc_ref[...] = jnp.zeros_like(acc_ref)

    tile_rows = x_ref.shape[0]
    # Logical (un-clamped) block index this step covers.
    b = pl.program_id(0) * pl.num_programs(1) + j

    s = scale_ref[0]
    x = x_ref[...].astype(jnp.float32)
    y = y_ref[...].astype(jnp.float32)
    # Match torch: log(1 + t*scale), two logs, f32.
    d = jnp.log(1.0 + x * s) - jnp.log(1.0 + y * s)
    dd = d * d

    # Mask rows past the end of the data (ragged last block, and the clamped
    # duplicate block the second core slice sees when the block count is odd).
    row_ids = b * tile_rows + lax.broadcasted_iota(jnp.int32, dd.shape, 0)
    dd = jnp.where(row_ids < valid_rows, dd, 0.0)

    # Fold (tile_rows, 128) -> (8, 128) with pure VPU vreg adds; keep the full
    # cross-lane/sublane reduction off the per-step critical path.
    acc_ref[...] += dd.reshape(tile_rows // SUBLANES, SUBLANES, LANES).sum(axis=0)


@functools.partial(jax.jit, static_argnames=("tile_rows",))
def rmsle_loss_pallas(output, Y, scale, *, tile_rows=2048):
    assert output.shape == Y.shape
    assert tile_rows % SUBLANES == 0
    n_elems = output.size

    # Flatten in the source dtype (no copy, no upcast).
    x = output.reshape(-1)
    y = Y.reshape(-1)

    # Pad only the ragged tail (< 1024 elements) when needed; the zero pad
    # contributes log(1+0) - log(1+0) = 0 to the sum.
    pad = (-n_elems) % (SUBLANES * LANES)
    if pad:
        x = jnp.pad(x, (0, pad))
        y = jnp.pad(y, (0, pad))
    rows = (n_elems + pad) // LANES            # multiple of 8
    x = x.reshape(rows, LANES)
    y = y.reshape(rows, LANES)

    tr = min(tile_rows, rows)                  # both multiples of 8
    num_blocks = (rows + tr - 1) // tr
    blocks_per_core = (num_blocks + NUM_CORES - 1) // NUM_CORES

    def in_idx(c, j):
        # Clamp so the DMA never points past the array; the kernel masks any
        # clamped (duplicate) block via its logical row index.
        return (jnp.minimum(c * blocks_per_core + j, num_blocks - 1), 0)

    scale_arr = jnp.asarray(scale, jnp.float32).reshape(1)

    partials = pl.pallas_call(
        functools.partial(_rmsle_kernel, valid_rows=rows),
        out_shape=jax.ShapeDtypeStruct((NUM_CORES * SUBLANES, LANES), jnp.float32),
        grid_spec=pltpu.PrefetchScalarGridSpec(
            num_scalar_prefetch=0,
            grid=(NUM_CORES, blocks_per_core),
            in_specs=[
                pl.BlockSpec(memory_space=pltpu.SMEM),        # scale (1,)
                pl.BlockSpec((tr, LANES), in_idx),            # output
                pl.BlockSpec((tr, LANES), in_idx),            # Y
            ],
            out_specs=pl.BlockSpec((SUBLANES, LANES), lambda c, j: (c, 0)),
        ),
        compiler_params=pltpu.CompilerParams(
            dimension_semantics=("parallel", "arbitrary"),
        ),
    )(scale_arr, x, y)

    # Tiny epilogue: combine per-core vreg partials, mean, sqrt.
    return jnp.sqrt(jnp.sum(partials) / n_elems)


def rmsle_loss_ref(output, Y, scale):
    d = jnp.log(1.0 + output * scale) - jnp.log(1.0 + Y * scale)
    return jnp.sqrt(jnp.mean(d * d))


if __name__ == "__main__":
    key = jax.random.PRNGKey(0)
    k1, k2 = jax.random.split(key)

    # Small NCHW-shaped prediction / target tensors (non-negative, as RMSLE expects).
    B, C, H, W = 2, 4, 16, 16
    output = jax.random.uniform(k1, (B, C, H, W), dtype=jnp.float32)
    Y = jax.random.uniform(k2, (B, C, H, W), dtype=jnp.float32)
    scale = 3.0

    loss = rmsle_loss_pallas(output, Y, scale)
    loss = jax.block_until_ready(loss)

    ref = rmsle_loss_ref(output, Y, scale)
    assert jnp.allclose(loss, ref, rtol=1e-5, atol=1e-6), (loss, ref)

    print("KERNEL_OK")
</pallas_src>

<mosaic_0001>
module attributes {stable_mosaic.version = 11 : i64} {
  func.func @_rmsle_kernel(%arg0: i32, %arg1: i32, %arg2: memref<1xf32, #tpu.memory_space<smem>>, %arg3: memref<16x128xf32, #tpu.memory_space<vmem>>, %arg4: memref<16x128xf32, #tpu.memory_space<vmem>>, %arg5: memref<8x128xf32, #tpu.memory_space<vmem>>) attributes {dimension_semantics = [#tpu.dimension_semantics<parallel>, #tpu.dimension_semantics<arbitrary>], iteration_bounds = array<i64: 2, 1>, scalar_prefetch = 0 : i64, scratch_operands = 0 : i64, tpu.core_type = #tpu.core_type<tc>, window_params = [{transform_indices = @transform_0, window_bounds = array<i64: 1>}, {transform_indices = @transform_1, window_bounds = array<i64: 16, 128>}, {transform_indices = @transform_2, window_bounds = array<i64: 16, 128>}, {transform_indices = @transform_3, window_bounds = array<i64: 8, 128>}]} {
    %c0_i32 = arith.constant 0 : i32
    %0 = arith.cmpi eq, %arg1, %c0_i32 : i32
    %1 = arith.extui %0 : i1 to i32
    %c0_i32_0 = arith.constant 0 : i32
    %2 = arith.cmpi ne, %1, %c0_i32_0 : i32
    scf.if %2 {
      %cst_13 = arith.constant 0.000000e+00 : f32
      %33 = vector.broadcast %cst_13 : f32 to vector<8x128xf32>
      %c0_14 = arith.constant 0 : index
      %c0_15 = arith.constant 0 : index
      %34 = vector.load %arg5[%c0_14, %c0_15] : memref<8x128xf32, #tpu.memory_space<vmem>>, vector<8x128xf32>
      tpu.vector_store %arg5[%c0_14, %c0_15], %33 {strides = array<i32>} : memref<8x128xf32, #tpu.memory_space<vmem>>, vector<8x128xf32>,
    } else {
    }
    %c1_i32 = arith.constant 1 : i32
    %3 = arith.muli %arg0, %c1_i32 : i32
    %4 = arith.addi %3, %arg1 : i32
    %c0 = arith.constant 0 : index
    %5 = memref.load %arg2[%c0] : memref<1xf32, #tpu.memory_space<smem>>
    %c0_1 = arith.constant 0 : index
    %c0_2 = arith.constant 0 : index
    %6 = vector.load %arg3[%c0_1, %c0_2] : memref<16x128xf32, #tpu.memory_space<vmem>>, vector<16x128xf32>
    %c0_3 = arith.constant 0 : index
    %c0_4 = arith.constant 0 : index
    %7 = vector.load %arg4[%c0_3, %c0_4] : memref<16x128xf32, #tpu.memory_space<vmem>>, vector<16x128xf32>
    %8 = vector.broadcast %5 : f32 to vector<16x128xf32>
    %9 = arith.mulf %6, %8 : vector<16x128xf32>
    %cst = arith.constant 1.000000e+00 : f32
    %10 = vector.broadcast %cst : f32 to vector<16x128xf32>
    %11 = arith.addf %10, %9 : vector<16x128xf32>
    %12 = math.log %11 : vector<16x128xf32>
    %13 = vector.broadcast %5 : f32 to vector<16x128xf32>
    %14 = arith.mulf %7, %13 : vector<16x128xf32>
    %cst_5 = arith.constant 1.000000e+00 : f32
    %15 = vector.broadcast %cst_5 : f32 to vector<16x128xf32>
    %16 = arith.addf %15, %14 : vector<16x128xf32>
    %17 = math.log %16 : vector<16x128xf32>
    %18 = arith.subf %12, %17 : vector<16x128xf32>
    %19 = arith.mulf %18, %18 : vector<16x128xf32>
    %c16_i32 = arith.constant 16 : i32
    %20 = arith.muli %4, %c16_i32 : i32
    %21 = tpu.iota {dimensions = array<i32: 0>} : vector<16x128xi32>
    %22 = vector.broadcast %20 : i32 to vector<16x128xi32>
    %23 = arith.addi %22, %21 : vector<16x128xi32>
    %c16_i32_6 = arith.constant 16 : i32
    %24 = vector.broadcast %c16_i32_6 : i32 to vector<16x128xi32>
    %25 = arith.cmpi slt, %23, %24 : vector<16x128xi32>
    %cst_7 = arith.constant 0.000000e+00 : f32
    %26 = vector.broadcast %cst_7 : f32 to vector<16x128xf32>
    %27 = arith.select %25, %19, %26 : vector<16x128xi1>, vector<16x128xf32>
    %c0_8 = arith.constant 0 : index
    %c0_9 = arith.constant 0 : index
    %28 = vector.load %arg5[%c0_8, %c0_9] : memref<8x128xf32, #tpu.memory_space<vmem>>, vector<8x128xf32>
    %29 = vector.shape_cast %27 : vector<16x128xf32> to vector<2x8x128xf32>
    %cst_10 = arith.constant dense<0.000000e+00> : vector<8x128xf32>
    %30 = vector.multi_reduction <add>, %29, %cst_10 [0] : vector<2x8x128xf32> to vector<8x128xf32>
    %31 = arith.addf %28, %30 : vector<8x128xf32>
    %c0_11 = arith.constant 0 : index
    %c0_12 = arith.constant 0 : index
    %32 = vector.load %arg5[%c0_11, %c0_12] : memref<8x128xf32, #tpu.memory_space<vmem>>, vector<8x128xf32>
    tpu.vector_store %arg5[%c0_11, %c0_12], %31 {strides = array<i32>} : memref<8x128xf32, #tpu.memory_space<vmem>>, vector<8x128xf32>,
    return
  }
  func.func @transform_0(%arg0: i32, %arg1: i32) -> i32 {
    %c0_i32 = arith.constant 0 : i32
    %c0_i32_0 = arith.constant 0 : i32
    return %c0_i32 : i32
  }
  func.func @transform_1(%arg0: i32, %arg1: i32) -> (i32, i32) {
    %c1_i32 = arith.constant 1 : i32
    %0 = arith.muli %arg0, %c1_i32 : i32
    %1 = arith.addi %0, %arg1 : i32
    %c0_i32 = arith.constant 0 : i32
    %2 = arith.minsi %1, %c0_i32 : i32
    %c0_i32_0 = arith.constant 0 : i32
    %c0_i32_1 = arith.constant 0 : i32
    return %2, %c0_i32_0 : i32, i32
  }
  func.func @transform_2(%arg0: i32, %arg1: i32) -> (i32, i32) {
    %c1_i32 = arith.constant 1 : i32
    %0 = arith.muli %arg0, %c1_i32 : i32
    %1 = arith.addi %0, %arg1 : i32
    %c0_i32 = arith.constant 0 : i32
    %2 = arith.minsi %1, %c0_i32 : i32
    %c0_i32_0 = arith.constant 0 : i32
    %c0_i32_1 = arith.constant 0 : i32
    return %2, %c0_i32_0 : i32, i32
  }
  func.func @transform_3(%arg0: i32, %arg1: i32) -> (i32, i32) {
    %c0_i32 = arith.constant 0 : i32
    %c0_i32_0 = arith.constant 0 : i32
    return %arg0, %c0_i32 : i32, i32
  }
}

</mosaic_0001>

<bundles_post_ra>
// kernel: rmsle_loss_pallas.1
= control target key start
LH: loop header
LB: loop body
LE: loop exit
PB: predicated region body
PF: predicated region fallthrough
CT: control target
= control target key end

     0   :  { %s461_s14 = smov 0   ;;  %s463_s15 = smov 0   ;;  %s504_s0 = inlined_call_operand.<no memory space> [shape: f32[1], index: 0, kind: input, shape index: {}]   ;;  %s505_s1 = inlined_call_operand.vmem [shape: f32[16,128], index: 1, kind: input, shape index: {}]   ;;  %s506_s2 = inlined_call_operand.vmem [shape: f32[16,128], index: 2, kind: input, shape index: {}]   ;;  %s507_s3 = inlined_call_operand.vmem [shape: f32[16,128], index: 3, kind: output, shape index: {}]  }
   0x1   :  { %8 = sst [smem:[#allocation2]] %s504_s0  ;;  %s465_s16 = smov 0  }
   0x2 LB: > { %s26_s0 = sadd.s32 1, %s432_s15  ;;  %p372_p0 = scmp.ge.s32.totalorder %s436_s16, 1  ;;  %s436_s16 = sphi %s465_s16, %s14_s16   ;;  %s432_s15 = sphi %s463_s15, %s509_s15   ;;  %s428_s14 = sphi %s461_s14, %s508_s14  }
   0x3   : > { %p28_p1 = scmp.ge.s32.totalorder %s26_s0, 2  ;;  %p186_p2 = scmp.lt.s32.totalorder %s436_s16, 3 }
   0x5   : > { %s511_s0 = smov (%p28_p1, %s26_s0), 0  ;;  %p187_p3 = pnand %p372_p0, %p186_p2 }
   0x6   : > { %p221_p4 = scmp.lt.s32.totalorder (!%p187_p3), %s428_s14, 0  ;;  %s254_s17 = sld [smem:[#allocation2]] (!%p187_p3)  ;;  %v281_v13 = vlaneseq (!%p187_p3) }
   0x7   : > { %190 = sbr.rel (%p187_p3) target bundleno = 51 (0x33), region = 32  ;;  %s378_s27 = sshll.u32 (!%p187_p3), %s428_s14, 4 }
   0x8   : > { %v282_v14 = vshrl.u32 (!%p187_p3), %v281_v13, 7  ;;  %v284_v16 = vstv (!%p187_p3), %s378_s27  ;;  %p244_p6 = scmp.lt.s32.totalorder (!%p187_p3), %s428_s14, 1 }
   0xa   : > { %v283_v15 = vadd.s32 (!%p187_p3), 8, %v282_v14  ;;  %v285_v22 = vadd.s32 (!%p187_p3), %v284_v16, %v282_v14 }
   0xc   : > { %v259_v0 = vstv (!%p187_p3), %s254_s17  ;;  %v286_v25 = vadd.s32 (!%p187_p3), %v284_v16, %v283_v15  ;;  %vm287_vm0 = vcmp.lt.s32.totalorder (!%p187_p3), %v285_v22, 16 }
   0xe   : > { %s222_s18 = scalar_select %p221_p4, %s428_s14, 0  ;;  %vm288_vm1 = vcmp.lt.s32.totalorder %v286_v25, 16 }
   0xf   : > { %s515_s14 = smov (!%p244_p6, %s428_s14), 1 }
  0x10   : > { %s373_s19 = sshll.u32 %s222_s18, 1  ;;  %s377_s28 = sshll.u32 %s515_s14, 3 }
  0x11   : > { %p224_p5 = scmp.lt.s32.totalorder %s373_s19, 1  ;;  %s247_s4 = scalar_lea.vmem %s507_s3, %s377_s28 }
  0x13   : > { %s513_s19 = smov (!%p224_p5, %s373_s19), 1 }
  0x14   : > { %s374_s20 = sshll.u32 %s513_s19, 3 }
  0x15   : > { %s227_s23 = scalar_lea.vmem %s505_s1, %s374_s20  ;;  %s239_s26 = scalar_lea.vmem %s506_s2, %s374_s20 }
  0x16   : > { %v255_v1 = vld [vmem:[%s227_s23] sm:$0xff]  ;;  %v256_v2 = vld [vmem:[%s227_s23 + $0x8] sm:$0xff] }
  0x17   : > { %v257_v3 = vld [vmem:[%s239_s26] sm:$0xff]  ;;  %v258_v4 = vld [vmem:[%s239_s26 + $0x8] sm:$0xff]  ;;  %v260_v5 = vmul.f32 %v259_v0, %v255_v1  ;;  %v261_v6 = vmul.f32 %v259_v0, %v256_v2 }
  0x18   : > { %v268_v7 = vmul.f32 %v259_v0, %v257_v3  ;;  %v269_v8 = vmul.f32 %v259_v0, %v258_v4 }
  0x19   : > { %v262_v9 = vadd.f32 1.0, %v260_v5  ;;  %v263_v10 = vadd.f32 1.0, %v261_v6 }
  0x1a   : > { %v270_v11 = vadd.f32 1.0, %v268_v7  ;;  %v271_v12 = vadd.f32 1.0, %v269_v8 }
  0x1b   : > { %406 = vlog2.f32 %v262_v9 }
  0x1c   : > { %408 = vlog2.f32 %v263_v10 }
  0x1d   : > { %410 = vlog2.f32 %v270_v11 }
  0x1e   : > { %412 = vlog2.f32 %v271_v12 }
  0x25   : > { %v407_v17 = vpop.eup %406 }
  0x26   : > { %v409_v18 = vpop.eup %408  ;;  %v265_v19 = vmul.f32 0.6931472, %v407_v17 }
  0x27   : > { %v411_v20 = vpop.eup %410  ;;  %v267_v21 = vmul.f32 0.6931472, %v409_v18 }
  0x28   : > { %v413_v23 = vpop.eup %412  ;;  %v273_v24 = vmul.f32 0.6931472, %v411_v20 }
  0x29   : > { %v275_v26 = vmul.f32 0.6931472, %v413_v23 }
  0x2a   : > { %v276_v27 = vsub.f32 %v265_v19, %v273_v24 }
  0x2b   : > { %v277_v28 = vsub.f32 %v267_v21, %v275_v26 }
  0x2c   : > { %v278_v29 = vmul.f32 %v276_v27, %v276_v27 }
  0x2d   : > { %v279_v30 = vmul.f32 %v277_v28, %v277_v28 }
  0x2e   : > { %v289_v31 = vsel %vm287_vm0, %v278_v29, 0.0 }
  0x2f   : > { %v290_v32 = vsel %vm288_vm1, %v279_v30, 0.0 }
  0x30   : > { %v292_v33 = vadd.f32 %v290_v32, %v289_v31 }
  0x32   : > { %294 = vst [vmem:[%s247_s4] sm:$0xff] %v292_v33 }
  0x33 PF: > { %s14_s16 = sadd.s32 1, %s436_s16   ;;  %s508_s14 = smov %s432_s15 }
  0x34   : > { %p11_p7 = scmp.ge.s32.totalorder %s14_s16, 4   ;;  %s509_s15 = smov %s511_s0 }
  0x36   :  { %13 = sbr.rel (!%p11_p7) target bundleno = 2 (0x2), region = 69 }

</bundles_post_ra>
